<compile_context>
chip_gen: v7x
topology: tpu7x:2x2x1
jax: 0.10.0
libtpu: 0.0.40
codegen_flags: <defaults>
</compile_context>

<pallas_src>
import math
from functools import partial

import jax
import jax.numpy as jnp
from jax import lax
from jax.experimental import pallas as pl
from jax.experimental.pallas import tpu as pltpu

IN_DIM = 11
HID = 40
OUT_DIM = 4
BN_EPS = 1e-5
LRELU_SLOPE = 0.01


def _leaky_relu(x):
    return jnp.where(x > 0, x, LRELU_SLOPE * x)


def _batchnorm_fm(h, inv_b):
    # h: (features, B) with batch on the lane axis.
    # Single reduction pass: sum and sum-of-squares; var = E[x^2] - mean^2 (biased),
    # matching nn.BatchNorm1d in training mode with gamma=1, beta=0.
    s = jnp.sum(h, axis=1, keepdims=True)
    sq = jnp.sum(h * h, axis=1, keepdims=True)
    mean = s * inv_b
    var = jnp.maximum(sq * inv_b - mean * mean, 0.0)
    scale = lax.rsqrt(var + BN_EPS)          # EUP rsqrt
    shift = -mean * scale                    # per-feature (features, 1)
    return h * scale + shift                 # per-element affine


def actor_kernel(x_ref, w1_ref, b1_ref, w2_ref, b2_ref, w3_ref, b3_ref, out_ref,
                 *, inv_b):
    x = x_ref[...]                                                    # (11, B)

    # linear_a1 + LeakyReLU + bn1
    h = jnp.dot(w1_ref[...], x, preferred_element_type=jnp.float32) + b1_ref[...]
    h = _batchnorm_fm(_leaky_relu(h), inv_b)                          # (40, B)

    # linear_a2 + LeakyReLU + bn2
    h = jnp.dot(w2_ref[...], h, preferred_element_type=jnp.float32) + b2_ref[...]
    h = _batchnorm_fm(_leaky_relu(h), inv_b)                          # (40, B)

    # linear_a + sigmoid (lane-dense (4, B) store)
    o = jnp.dot(w3_ref[...], h, preferred_element_type=jnp.float32) + b3_ref[...]
    out_ref[...] = jax.nn.sigmoid(o)


def _vmem_limit_bytes(batch):
    # whole batch resident: x (11) + 2 hidden (40+40) + output (4) floats per row
    act_bytes = 4 * batch * (IN_DIM + 2 * HID + OUT_DIM)
    weight_bytes = 4 * (HID * IN_DIM + HID + HID * HID + HID + OUT_DIM * HID + OUT_DIM)
    needed = 2 * act_bytes + weight_bytes + (4 << 20)   # headroom for compiler scratch
    # raise the default scoped limit for big B, stay <= v7x's 64 MiB per-TC VMEM
    return int(min(max(needed, 32 << 20), 64 << 20))


def openai_actor_forward(x, params):
    """x: (B, 11) float32 -> (B, 4) float32 (sigmoid policy)."""
    B = x.shape[0]
    w1, b1, w2, b2, w3, b3 = params
    x_fm = x.T                                   # (11, B): batch on the lane axis
    vmem = pl.BlockSpec(memory_space=pltpu.MemorySpace.VMEM)
    out_fm = pl.pallas_call(
        partial(actor_kernel, inv_b=1.0 / B),
        out_shape=jax.ShapeDtypeStruct((OUT_DIM, B), jnp.float32),
        in_specs=[vmem] * 7,
        out_specs=vmem,
        compiler_params=pltpu.CompilerParams(vmem_limit_bytes=_vmem_limit_bytes(B)),
    )(x_fm, w1, b1, w2, b2, w3, b3)
    return out_fm.T                              # (B, 4)


def _xavier_uniform(key, fan_out, fan_in, gain):
    # torch layout: (out_features, in_features); bound symmetric in fan_in/fan_out
    bound = gain * math.sqrt(6.0 / (fan_in + fan_out))
    return jax.random.uniform(key, (fan_out, fan_in), jnp.float32, -bound, bound)


def _linear_bias(key, fan_in, fan_out):
    # default nn.Linear bias init: U(-1/sqrt(fan_in), 1/sqrt(fan_in)); kept (out, 1)
    bound = 1.0 / math.sqrt(fan_in)
    return jax.random.uniform(key, (fan_out, 1), jnp.float32, -bound, bound)


def init_params(key):
    gain = math.sqrt(2.0 / (1.0 + LRELU_SLOPE ** 2))  # calculate_gain('leaky_relu')
    ks = jax.random.split(key, 6)
    w1 = _xavier_uniform(ks[0], HID, IN_DIM, gain)
    b1 = _linear_bias(ks[1], IN_DIM, HID)
    w2 = _xavier_uniform(ks[2], HID, HID, gain)
    b2 = _linear_bias(ks[3], HID, HID)
    w3 = _xavier_uniform(ks[4], OUT_DIM, HID, gain)
    b3 = _linear_bias(ks[5], HID, OUT_DIM)
    return (w1, b1, w2, b2, w3, b3)


def reference_forward(x, params):
    # pure-JAX reference in the standard (B, features) layout
    w1, b1, w2, b2, w3, b3 = params

    def bn(h):
        mean = jnp.mean(h, axis=0, keepdims=True)
        var = jnp.mean((h - mean) ** 2, axis=0, keepdims=True)
        return (h - mean) * lax.rsqrt(var + BN_EPS)

    h = bn(_leaky_relu(x @ w1.T + b1[:, 0]))
    h = bn(_leaky_relu(h @ w2.T + b2[:, 0]))
    return jax.nn.sigmoid(h @ w3.T + b3[:, 0])


if __name__ == "__main__":
    key = jax.random.PRNGKey(0)
    pkey, xkey = jax.random.split(key)
    params = init_params(pkey)

    B = 16
    x = jax.random.normal(xkey, (B, IN_DIM), dtype=jnp.float32)

    out = openai_actor_forward(x, params)
    out = jax.block_until_ready(out)

    ref = reference_forward(x, params)
    assert out.shape == (B, OUT_DIM)
    assert jnp.allclose(out, ref, atol=2e-5, rtol=2e-5), float(jnp.max(jnp.abs(out - ref)))

    print("KERNEL_OK")
</pallas_src>

<mosaic_0001>
module attributes {stable_mosaic.version = 11 : i64} {
  func.func @actor_kernel(%arg0: memref<11x16xf32, #tpu.memory_space<vmem>>, %arg1: memref<40x11xf32, #tpu.memory_space<vmem>>, %arg2: memref<40x1xf32, #tpu.memory_space<vmem>>, %arg3: memref<40x40xf32, #tpu.memory_space<vmem>>, %arg4: memref<40x1xf32, #tpu.memory_space<vmem>>, %arg5: memref<4x40xf32, #tpu.memory_space<vmem>>, %arg6: memref<4x1xf32, #tpu.memory_space<vmem>>, %arg7: memref<4x16xf32, #tpu.memory_space<vmem>>) attributes {dimension_semantics = [], scalar_prefetch = 0 : i64, scratch_operands = 0 : i64, tpu.core_type = #tpu.core_type<tc>} {
    %c0 = arith.constant 0 : index
    %c0_0 = arith.constant 0 : index
    %0 = vector.load %arg0[%c0, %c0_0] : memref<11x16xf32, #tpu.memory_space<vmem>>, vector<11x16xf32>
    %c0_1 = arith.constant 0 : index
    %c0_2 = arith.constant 0 : index
    %1 = vector.load %arg1[%c0_1, %c0_2] : memref<40x11xf32, #tpu.memory_space<vmem>>, vector<40x11xf32>
    %cst = arith.constant dense<0.000000e+00> : vector<40x16xf32>
    %2 = tpu.matmul %1, %0, %cst {dimension_numbers = #tpu.dot_dimension_numbers<[1], [0], [0], [1], [0, 0, 1, 1], [], []>} : vector<40x11xf32>, vector<11x16xf32>, vector<40x16xf32> -> vector<40x16xf32>
    %c0_3 = arith.constant 0 : index
    %c0_4 = arith.constant 0 : index
    %3 = vector.load %arg2[%c0_3, %c0_4] : memref<40x1xf32, #tpu.memory_space<vmem>>, vector<40x1xf32>
    %4 = vector.broadcast %3 : vector<40x1xf32> to vector<40x16xf32>
    %5 = arith.addf %2, %4 : vector<40x16xf32>
    %cst_5 = arith.constant 0.000000e+00 : f32
    %6 = vector.broadcast %cst_5 : f32 to vector<40x16xf32>
    %7 = arith.cmpf ogt, %5, %6 : vector<40x16xf32>
    %cst_6 = arith.constant 0.00999999977 : f32
    %8 = vector.broadcast %cst_6 : f32 to vector<40x16xf32>
    %9 = arith.mulf %8, %5 : vector<40x16xf32>
    %10 = arith.select %7, %5, %9 : vector<40x16xi1>, vector<40x16xf32>
    %cst_7 = arith.constant dense<0.000000e+00> : vector<40xf32>
    %11 = vector.multi_reduction <add>, %10, %cst_7 [1] : vector<40x16xf32> to vector<40xf32>
    %12 = vector.shape_cast %11 : vector<40xf32> to vector<40x1xf32>
    %13 = arith.mulf %10, %10 : vector<40x16xf32>
    %cst_8 = arith.constant dense<0.000000e+00> : vector<40xf32>
    %14 = vector.multi_reduction <add>, %13, %cst_8 [1] : vector<40x16xf32> to vector<40xf32>
    %15 = vector.shape_cast %14 : vector<40xf32> to vector<40x1xf32>
    %cst_9 = arith.constant 6.250000e-02 : f32
    %16 = vector.broadcast %cst_9 : f32 to vector<40x1xf32>
    %17 = arith.mulf %12, %16 : vector<40x1xf32>
    %cst_10 = arith.constant 6.250000e-02 : f32
    %18 = vector.broadcast %cst_10 : f32 to vector<40x1xf32>
    %19 = arith.mulf %15, %18 : vector<40x1xf32>
    %20 = arith.mulf %17, %17 : vector<40x1xf32>
    %21 = arith.subf %19, %20 : vector<40x1xf32>
    %cst_11 = arith.constant 0.000000e+00 : f32
    %22 = vector.broadcast %cst_11 : f32 to vector<40x1xf32>
    %23 = arith.maximumf %21, %22 : vector<40x1xf32>
    %cst_12 = arith.constant 9.99999974E-6 : f32
    %24 = vector.broadcast %cst_12 : f32 to vector<40x1xf32>
    %25 = arith.addf %23, %24 : vector<40x1xf32>
    %26 = math.rsqrt %25 : vector<40x1xf32>
    %cst_13 = arith.constant 0.000000e+00 : f32
    %27 = vector.broadcast %cst_13 : f32 to vector<40x1xf32>
    %28 = arith.subf %27, %17 : vector<40x1xf32>
    %29 = arith.mulf %28, %26 : vector<40x1xf32>
    %30 = vector.broadcast %26 : vector<40x1xf32> to vector<40x16xf32>
    %31 = arith.mulf %10, %30 : vector<40x16xf32>
    %32 = vector.broadcast %29 : vector<40x1xf32> to vector<40x16xf32>
    %33 = arith.addf %31, %32 : vector<40x16xf32>
    %c0_14 = arith.constant 0 : index
    %c0_15 = arith.constant 0 : index
    %34 = vector.load %arg3[%c0_14, %c0_15] : memref<40x40xf32, #tpu.memory_space<vmem>>, vector<40x40xf32>
    %cst_16 = arith.constant dense<0.000000e+00> : vector<40x16xf32>
    %35 = tpu.matmul %34, %33, %cst_16 {dimension_numbers = #tpu.dot_dimension_numbers<[1], [0], [0], [1], [0, 0, 1, 1], [], []>} : vector<40x40xf32>, vector<40x16xf32>, vector<40x16xf32> -> vector<40x16xf32>
    %c0_17 = arith.constant 0 : index
    %c0_18 = arith.constant 0 : index
    %36 = vector.load %arg4[%c0_17, %c0_18] : memref<40x1xf32, #tpu.memory_space<vmem>>, vector<40x1xf32>
    %37 = vector.broadcast %36 : vector<40x1xf32> to vector<40x16xf32>
    %38 = arith.addf %35, %37 : vector<40x16xf32>
    %cst_19 = arith.constant 0.000000e+00 : f32
    %39 = vector.broadcast %cst_19 : f32 to vector<40x16xf32>
    %40 = arith.cmpf ogt, %38, %39 : vector<40x16xf32>
    %cst_20 = arith.constant 0.00999999977 : f32
    %41 = vector.broadcast %cst_20 : f32 to vector<40x16xf32>
    %42 = arith.mulf %41, %38 : vector<40x16xf32>
    %43 = arith.select %40, %38, %42 : vector<40x16xi1>, vector<40x16xf32>
    %cst_21 = arith.constant dense<0.000000e+00> : vector<40xf32>
    %44 = vector.multi_reduction <add>, %43, %cst_21 [1] : vector<40x16xf32> to vector<40xf32>
    %45 = vector.shape_cast %44 : vector<40xf32> to vector<40x1xf32>
    %46 = arith.mulf %43, %43 : vector<40x16xf32>
    %cst_22 = arith.constant dense<0.000000e+00> : vector<40xf32>
    %47 = vector.multi_reduction <add>, %46, %cst_22 [1] : vector<40x16xf32> to vector<40xf32>
    %48 = vector.shape_cast %47 : vector<40xf32> to vector<40x1xf32>
    %cst_23 = arith.constant 6.250000e-02 : f32
    %49 = vector.broadcast %cst_23 : f32 to vector<40x1xf32>
    %50 = arith.mulf %45, %49 : vector<40x1xf32>
    %cst_24 = arith.constant 6.250000e-02 : f32
    %51 = vector.broadcast %cst_24 : f32 to vector<40x1xf32>
    %52 = arith.mulf %48, %51 : vector<40x1xf32>
    %53 = arith.mulf %50, %50 : vector<40x1xf32>
    %54 = arith.subf %52, %53 : vector<40x1xf32>
    %cst_25 = arith.constant 0.000000e+00 : f32
    %55 = vector.broadcast %cst_25 : f32 to vector<40x1xf32>
    %56 = arith.maximumf %54, %55 : vector<40x1xf32>
    %cst_26 = arith.constant 9.99999974E-6 : f32
    %57 = vector.broadcast %cst_26 : f32 to vector<40x1xf32>
    %58 = arith.addf %56, %57 : vector<40x1xf32>
    %59 = math.rsqrt %58 : vector<40x1xf32>
    %cst_27 = arith.constant 0.000000e+00 : f32
    %60 = vector.broadcast %cst_27 : f32 to vector<40x1xf32>
    %61 = arith.subf %60, %50 : vector<40x1xf32>
    %62 = arith.mulf %61, %59 : vector<40x1xf32>
    %63 = vector.broadcast %59 : vector<40x1xf32> to vector<40x16xf32>
    %64 = arith.mulf %43, %63 : vector<40x16xf32>
    %65 = vector.broadcast %62 : vector<40x1xf32> to vector<40x16xf32>
    %66 = arith.addf %64, %65 : vector<40x16xf32>
    %c0_28 = arith.constant 0 : index
    %c0_29 = arith.constant 0 : index
    %67 = vector.load %arg5[%c0_28, %c0_29] : memref<4x40xf32, #tpu.memory_space<vmem>>, vector<4x40xf32>
    %cst_30 = arith.constant dense<0.000000e+00> : vector<4x16xf32>
    %68 = tpu.matmul %67, %66, %cst_30 {dimension_numbers = #tpu.dot_dimension_numbers<[1], [0], [0], [1], [0, 0, 1, 1], [], []>} : vector<4x40xf32>, vector<40x16xf32>, vector<4x16xf32> -> vector<4x16xf32>
    %c0_31 = arith.constant 0 : index
    %c0_32 = arith.constant 0 : index
    %69 = vector.load %arg6[%c0_31, %c0_32] : memref<4x1xf32, #tpu.memory_space<vmem>>, vector<4x1xf32>
    %70 = vector.broadcast %69 : vector<4x1xf32> to vector<4x16xf32>
    %71 = arith.addf %68, %70 : vector<4x16xf32>
    %72 = arith.negf %71 : vector<4x16xf32>
    %73 = math.exp %72 : vector<4x16xf32>
    %cst_33 = arith.constant 1.000000e+00 : f32
    %74 = vector.broadcast %cst_33 : f32 to vector<4x16xf32>
    %75 = arith.addf %74, %73 : vector<4x16xf32>
    %76 = arith.divf %74, %75 : vector<4x16xf32>
    %c0_34 = arith.constant 0 : index
    %c0_35 = arith.constant 0 : index
    %77 = vector.load %arg7[%c0_34, %c0_35] : memref<4x16xf32, #tpu.memory_space<vmem>>, vector<4x16xf32>
    tpu.vector_store %arg7[%c0_34, %c0_35], %76 {strides = array<i32>} : memref<4x16xf32, #tpu.memory_space<vmem>>, vector<4x16xf32>,
    return
  }
}

</mosaic_0001>

<bundles_post_ra>
// kernel: tpu_custom_call.1
= control target key start
LH: loop header
LB: loop body
LE: loop exit
PB: predicated region body
PF: predicated region fallthrough
CT: control target
= control target key end

     0   :  { %vm80_vm0 = vcmask 1042432   ;;  %v793_v2 = vmov 0.0|0.0   ;;  %vm794_vm1 = vmmov 1   ;;  %vm795_vm3 = vmmov 0   ;;  %s1043_s0 = inlined_call_operand.vmem [shape: f32[11,16], index: 0, kind: input, shape index: {}]   ;;  %s1044_s1 = inlined_call_operand.vmem [shape: f32[40,11], index: 1, kind: input, shape index: {}]   ;;  %s1045_s2 = inlined_call_operand.vmem [shape: f32[40,1], index: 2, kind: input, shape index: {}]   ;;  %s1046_s3 = inlined_call_operand.vmem [shape: f32[40,40], index: 3, kind: input, shape index: {}]   ;;  %s1047_s4 = inlined_call_operand.vmem [shape: f32[40,1], index: 4, kind: input, shape index: {}]   ;;  %s1048_s5 = inlined_call_operand.vmem [shape: f32[4,40], index: 5, kind: input, shape index: {}]   ;;  %s1049_s6 = inlined_call_operand.vmem [shape: f32[4,1], index: 6, kind: input, shape index: {}]   ;;  %s1050_s7 = inlined_call_operand.hbm [shape: f32[4,16], index: 7, kind: output, shape index: {}]  }
   0x1   :  { %v27_v0 = vld [vmem:[%s1043_s0] sm:$0xff]  ;;  %v28_v1 = vld [vmem:[%s1043_s0 + $0x8] sm:$0x7]  ;;  %721 = vmatprep.subr.bf16.mxu0 %v793_v2  ;;  %vm723_vm2 = vmpackc.low %vm80_vm0, %vm794_vm1  ;;  %725 = vmatprep.subr.bf16.mxu1 %v793_v2  ;;  %v796_v4 = vmov 0.0   ;;  %vm64_vm4 = vcmask 89088   ;;  %v797_v6 = vmov 0  }
   0x2   :  { %v722_v3 = vpack.c.bf16 %v28_v1, %v27_v0  ;;  %668 = vmatprep.mubr.msk.f32.mxu0 %vm795_vm3, %v796_v4  ;;  %693 = vmatprep.mubr.msk.f32.mxu1 %vm795_vm3, %v796_v4  ;;  %v29_v5 = vld [vmem:[%s1044_s1] sm:$0xff]  ;;  %v36_v8 = vld [vmem:[%s1045_s2 + $0x10] sm:$0xff] }
   0x3   :  { %743 = vset.pattern.permute.xlu0 %v797_v6  ;;  %v34_v7 = vld [vmem:[%s1045_s2] sm:$0xff]  ;;  %744 = vset.pattern.permute.xlu1 %v797_v6 }
   0x4   :  { %724 = vmatpush3.bf16.msk.msra.mxu0 %vm723_vm2, %v722_v3  ;;  %41 = vperm.xlu0 %743, %v34_v7  }
   0x5   :  { %12 = vsyncpa [#allocation3], 0  ;;  %v35_v9 = vld [vmem:[%s1045_s2 + $0x8] sm:$0xff]  ;;  %51 = vperm.xlu1 %744, %v36_v8   ;;  %731 = vmatprep.subr.bf16.mxu0 %v793_v2  ;;  %v37_v10 = vld [vmem:[%s1045_s2 + $0x18] sm:$0xff]  ;;  %vm189_vm6 = vcmask 130048   ;;  %vm315_vm11 = vcmask 326656  }
   0x6   :  { %v30_v11 = vld [vmem:[%s1044_s1 + $0x8] sm:$0xff]  ;;  %v38_v12 = vld [vmem:[%s1045_s2 + $0x20] sm:$0xff]  ;;  %v31_v13 = vld [vmem:[%s1044_s1 + $0x10] sm:$0xff]  ;;  %s798_s19 = smov [#allocation2]   ;;  %vm612_vm1 = vcmask 125952  }
   0x7   :  { %669 = vmatmul.mubr.msk.f32.vlgmr.msra.gmra.mrb[0].mxu0 %vm64_vm4, %v29_v5  ;;  %v32_v14 = vld [vmem:[%s1044_s1 + $0x18] sm:$0xff]  ;;  %v33_v15 = vld [vmem:[%s1044_s1 + $0x20] sm:$0xff]  ;;  %v286_v61 = vld [vmem:[%s1047_s4 + $0x8] sm:$0xff]  ;;  %s620_s20 = sshll.u32 %s798_s19, 4  ;;  %s621_s20 = int_to_ptr.vmem [resolvable:$true] %s620_s20 }
   0x8   :  { %671 = vmatprep.mubr.msk.f32.mxu0 %vm795_vm3, %v796_v4  ;;  %46 = vperm.xlu0 %743, %v35_v9   ;;  %v285_v62 = vld [vmem:[%s1047_s4] sm:$0xff]  ;;  %v287_v63 = vld [vmem:[%s1047_s4 + $0x10] sm:$0xff]  ;;  %v288_v0 = vld [vmem:[%s1047_s4 + $0x18] sm:$0xff]  ;;  %s769_s21 = scalar_lea.vmem %s621_s20, 64  ;;  %p774_p1 = scmp.lt.s32.totalorder %s621_s20, %s621_s20 }
   0x9   :  { %56 = vperm.xlu1 %744, %v37_v10   ;;  %v289_v1 = vld [vmem:[%s1047_s4 + $0x20] sm:$0xff]  ;;  %p770_p0 = scmp.ne.s32.totalorder %s621_s20, %s769_s21  ;;  %p775_p2 = scmp.lt.s32.totalorder %s769_s21, %s769_s21 }
   0xb   :  { %672 = vmatmul.mubr.msk.f32.gmra.mrb[2].mxu0 %vm64_vm4, %v30_v11  ;;  %p776_p3 = por %p775_p2, %p774_p1 }
   0xc   :  { %674 = vmatprep.mubr.msk.f32.mxu0 %vm795_vm3, %v796_v4  ;;  %61 = vperm.xlu0 %743, %v38_v12  }
   0xd   :  { %p777_p4 = pnand %p776_p3, %p770_p0 }
   0xf   :  { %675 = vmatmul.mubr.msk.f32.gmra.mrb[4].mxu0 %vm64_vm4, %v31_v13 }
  0x10   :  { %677 = vmatprep.mubr.msk.f32.mxu0 %vm795_vm3, %v796_v4 }
  0x13   :  { %678 = vmatmul.mubr.msk.f32.gmra.mrb[6].mxu0 %vm64_vm4, %v32_v14 }
  0x14   :  { %680 = vmatprep.mubr.msk.f32.mxu0 %vm795_vm3, %v796_v4 }
  0x17   :  { %681 = vmatmul.mubr.msk.f32.gmra.mrb[8].mxu0 %vm64_vm4, %v33_v15 }
  0x18   :  { %718 = vmatprep.mubr.msk.f32.mxu0 %vm795_vm3, %v796_v4 }
  0x83   :  { %v42_v16 = vpop.permute.xlu0 %41 }
  0x84   :  { %v52_v26 = vpop.permute.xlu1 %51 }
  0x87   :  { %v47_v21 = vpop.permute.xlu0 %46 }
  0x88   :  { %v57_v37 = vpop.permute.xlu1 %56 }
  0x8b   :  { %v62_v45 = vpop.permute.xlu0 %61 }
  0xda   :  { %v150_v17 = vpop.f32.mrb[0].mxu0 }
  0xdb   :  { %v151_v18 = vadd.f32 %v150_v17, %v42_v16  ;;  %v670_v19 = vpop.f32.mrb[1].mxu0 }
  0xdd   :  { %v179_v20 = vmul.f32 0.01, %v151_v18  ;;  %vm174_vm5 = vcmp.gt.f32.partialorder %v151_v18, 0.0 }
  0xde   :  { %v155_v22 = vpop.f32.mrb[2].mxu0 }
  0xdf   :  { %v156_v23 = vadd.f32 %v155_v22, %v47_v21  ;;  %v673_v24 = vpop.f32.mrb[3].mxu0  ;;  %v897_v25 = vsel %vm174_vm5, %v151_v18, %v179_v20 }
  0xe0   :  { %v190_v27 = vsel %vm189_vm6, %v897_v25, 0.0  ;;  %v205_v28 = vmul.f32 %v897_v25, %v897_v25 }
  0xe1   :  { %vm175_vm7 = vcmp.gt.f32.partialorder %v156_v23, 0.0  ;;  %v180_v29 = vmul.f32 0.01, %v156_v23  ;;  %191 = vadd.xlane.f32.xlu1 %v190_v27 }
  0xe2   :  { %v160_v30 = vpop.f32.mrb[4].mxu0  ;;  %v210_v31 = vsel %vm189_vm6, %v205_v28, 0.0 }
  0xe3   :  { %v161_v32 = vadd.f32 %v160_v30, %v52_v26  ;;  %211 = vadd.xlane.f32.xlu0 %v210_v31  ;;  %v676_v33 = vpop.f32.mrb[5].mxu0  ;;  %v904_v34 = vsel %vm175_vm7, %v156_v23, %v180_v29 }
  0xe4   :  { %v206_v35 = vmul.f32 %v904_v34, %v904_v34  ;;  %v193_v40 = vsel %vm189_vm6, %v904_v34, 0.0 }
  0xe5   :  { %v181_v36 = vmul.f32 0.01, %v161_v32  ;;  %vm176_vm8 = vcmp.gt.f32.partialorder %v161_v32, 0.0 }
  0xe6   :  { %v165_v38 = vpop.f32.mrb[6].mxu0  ;;  %v213_v39 = vsel %vm189_vm6, %v206_v35, 0.0 }
  0xe7   :  { %v166_v41 = vadd.f32 %v165_v38, %v57_v37  ;;  %214 = vadd.xlane.f32.xlu1 %v213_v39  ;;  %194 = vadd.xlane.f32.xlu0 %v193_v40  ;;  %v679_v42 = vpop.f32.mrb[7].mxu0  ;;  %v911_v43 = vsel %vm176_vm8, %v161_v32, %v181_v36 }
  0xe8   :  { %v196_v47 = vsel %vm189_vm6, %v911_v43, 0.0  ;;  %v207_v48 = vmul.f32 %v911_v43, %v911_v43 }
  0xe9   :  { %v182_v44 = vmul.f32 0.01, %v166_v41  ;;  %vm177_vm9 = vcmp.gt.f32.partialorder %v166_v41, 0.0 }
  0xea   :  { %v170_v46 = vpop.f32.mrb[8].mxu0  ;;  %v216_v55 = vsel %vm189_vm6, %v207_v48, 0.0 }
  0xeb   :  { %v171_v49 = vadd.f32 %v170_v46, %v62_v45  ;;  %197 = vadd.xlane.f32.xlu0 %v196_v47  ;;  %v917_v50 = vsel %vm177_vm9, %v166_v41, %v182_v44  ;;  %v682_v51 = vpop.f32.mrb[9].mxu0 }
  0xec   :  { %v199_v52 = vsel %vm189_vm6, %v917_v50, 0.0  ;;  %v208_v53 = vmul.f32 %v917_v50, %v917_v50 }
  0xed   :  { %v183_v54 = vmul.f32 0.01, %v171_v49  ;;  %200 = vadd.xlane.f32.xlu1 %v199_v52  ;;  %vm178_vm10 = vcmp.gt.f32.partialorder %v171_v49, 0.0 }
  0xee   :  { %v219_v57 = vsel %vm189_vm6, %v208_v53, 0.0 }
  0xef   :  { %217 = vadd.xlane.f32.xlu0 %v216_v55  ;;  %v924_v56 = vsel %vm178_vm10, %v171_v49, %v183_v54 }
  0xf0   :  { %v209_v58 = vmul.f32 %v924_v56, %v924_v56  ;;  %v202_v59 = vsel %vm189_vm6, %v924_v56, 0.0 }
  0xf1   :  { %220 = vadd.xlane.f32.xlu1 %v219_v57 }
  0xf2   :  { %v222_v60 = vsel %vm189_vm6, %v209_v58, 0.0 }
  0xf3   :  { %203 = vadd.xlane.f32.xlu0 %v202_v59 }
  0xf5   :  { %223 = vadd.xlane.f32.xlu1 %v222_v60 }
 0x106   :  { %297 = vperm.xlu1 %744, %v286_v61  }
 0x109   :  { %292 = vperm.xlu0 %743, %v285_v62  }
 0x10a   :  { %302 = vperm.xlu1 %744, %v287_v63  }
 0x10d   :  { %307 = vperm.xlu0 %743, %v288_v0  }
 0x10e   :  { %312 = vperm.xlu1 %744, %v289_v1  }
 0x16e   :  { %v192_v3 = vpop.xlane.xlu1 %191 }
 0x16f   :  { %v225_v5 = vmul.f32 0.0625, %v192_v3 }
 0x170   :  { %v212_v6 = vpop.xlane.xlu0 %211 }
 0x171   :  { %v235_v7 = vmul.f32 %v225_v5, %v225_v5  ;;  %v230_v8 = vmul.f32 0.0625, %v212_v6  ;;  %v260_v45 = vsub.f32 0.0, %v225_v5 }
 0x173   :  { %v240_v9 = vsub.f32 %v230_v8, %v235_v7 }
 0x174   :  { %v215_v10 = vpop.xlane.xlu1 %214  ;;  %v195_v11 = vpop.xlane.xlu0 %194 }
 0x175   :  { %v245_v12 = vmax.f32 %v240_v9, 0.0  ;;  %v226_v13 = vmul.f32 0.0625, %v195_v11  ;;  %v231_v15 = vmul.f32 0.0625, %v215_v10 }
 0x177   :  { %v250_v14 = vadd.f32 1e-05, %v245_v12  ;;  %v236_v16 = vmul.f32 %v226_v13, %v226_v13  ;;  %v261_v47 = vsub.f32 0.0, %v226_v13  ;;  %v283_v12 = vld [vmem:[%s1046_s3 + $0x18] sm:$0xff]  ;;  %v284_v13 = vld [vmem:[%s1046_s3 + $0x20] sm:$0xff] }
 0x178   :  { %v198_v17 = vpop.xlane.xlu0 %197 }
 0x179   :  { %v241_v18 = vsub.f32 %v231_v15, %v236_v16  ;;  %v227_v19 = vmul.f32 0.0625, %v198_v17  ;;  %745 = vrsqrt.f32 %v250_v14 }
 0x17a   :  { %v201_v20 = vpop.xlane.xlu1 %200 }
 0x17b   :  { %v246_v21 = vmax.f32 %v241_v18, 0.0  ;;  %v228_v22 = vmul.f32 0.0625, %v201_v20  ;;  %v237_v26 = vmul.f32 %v227_v19, %v227_v19  ;;  %v262_v59 = vsub.f32 0.0, %v227_v19 }
 0x17c   :  { %v218_v23 = vpop.xlane.xlu0 %217 }
 0x17d   :  { %v251_v24 = vadd.f32 1e-05, %v246_v21  ;;  %v232_v27 = vmul.f32 0.0625, %v218_v23  ;;  %v238_v29 = vmul.f32 %v228_v22, %v228_v22  ;;  %v263_v62 = vsub.f32 0.0, %v228_v22 }
 0x17e   :  { %v221_v28 = vpop.xlane.xlu1 %220 }
 0x17f   :  { %747 = vrsqrt.f32 %v251_v24  ;;  %v242_v30 = vsub.f32 %v232_v27, %v237_v26  ;;  %v233_v31 = vmul.f32 0.0625, %v221_v28 }
 0x180   :  { %v204_v32 = vpop.xlane.xlu0 %203 }
 0x181   :  { %v247_v33 = vmax.f32 %v242_v30, 0.0  ;;  %v243_v35 = vsub.f32 %v233_v31, %v238_v29  ;;  %v229_v36 = vmul.f32 0.0625, %v204_v32 }
 0x182   :  { %v224_v37 = vpop.xlane.xlu1 %223 }
 0x183   :  { %v252_v38 = vadd.f32 1e-05, %v247_v33  ;;  %v248_v39 = vmax.f32 %v243_v35, 0.0  ;;  %v239_v40 = vmul.f32 %v229_v36, %v229_v36  ;;  %v234_v41 = vmul.f32 0.0625, %v224_v37  ;;  %v746_v42 = vpop.eup %745 }
 0x184   :  { %v265_v49 = vmul.f32 %v746_v42, %v260_v45  ;;  %v270_v51 = vmul.f32 %v746_v42, %v897_v25 }
 0x185   :  { %749 = vrsqrt.f32 %v252_v38  ;;  %v253_v44 = vadd.f32 1e-05, %v248_v39  ;;  %v244_v46 = vsub.f32 %v234_v41, %v239_v40 }
 0x186   :  { %v275_v57 = vadd.f32 %v270_v51, %v265_v49  ;;  %v298_v18 = vpop.permute.xlu1 %297 }
 0x187   :  { %751 = vrsqrt.f32 %v253_v44  ;;  %v249_v48 = vmax.f32 %v244_v46, 0.0 }
 0x188   :  { %v293_v14 = vpop.permute.xlu0 %292 }
 0x189   :  { %v748_v52 = vpop.eup %747  ;;  %v254_v54 = vadd.f32 1e-05, %v249_v48 }
 0x18a   :  { %v266_v53 = vmul.f32 %v748_v52, %v261_v47  ;;  %v271_v55 = vmul.f32 %v748_v52, %v904_v34  ;;  %v264_v34 = vsub.f32 0.0, %v229_v36  ;;  %v303_v28 = vpop.permute.xlu1 %302 }
 0x18b   :  { %753 = vrsqrt.f32 %v254_v54 }
 0x18c   :  { %v276_v58 = vadd.f32 %v271_v55, %v266_v53  ;;  %v308_v38 = vpop.permute.xlu0 %307 }
 0x18e   :  { %v726_v60 = vpack.c.bf16 %v276_v58, %v275_v57  ;;  %v313_v48 = vpop.permute.xlu1 %312 }
 0x18f   :  { %v750_v61 = vpop.eup %749 }
 0x190   :  { %727 = vmatpush3.bf16.msra.mxu1 %v726_v60  ;;  %v267_v63 = vmul.f32 %v750_v61, %v262_v59  ;;  %v272_v0 = vmul.f32 %v750_v61, %v911_v43  ;;  %v280_v43 = vld [vmem:[%s1046_s3] sm:$0xff] }
 0x191   :  { %v752_v1 = vpop.eup %751  ;;  %728 = vmatprep.subr.bf16.mxu1 %v793_v2 }
 0x192   :  { %v268_v25 = vmul.f32 %v752_v1, %v263_v62  ;;  %v273_v3 = vmul.f32 %v752_v1, %v917_v50  ;;  %v277_v5 = vadd.f32 %v272_v0, %v267_v63  ;;  %v281_v50 = vld [vmem:[%s1046_s3 + $0x8] sm:$0xff]  ;;  %v527_v0 = vld [vmem:[%s1049_s6] sm:$0xf] }
 0x194   :  { %v278_v6 = vadd.f32 %v273_v3, %v268_v25 }
 0x195   :  { %v754_v7 = vpop.eup %753 }
 0x196   :  { %v729_v8 = vpack.c.bf16 %v278_v6, %v277_v5  ;;  %v269_v9 = vmul.f32 %v754_v7, %v264_v34  ;;  %v274_v10 = vmul.f32 %v754_v7, %v924_v56  ;;  %v282_v56 = vld [vmem:[%s1046_s3 + $0x10] sm:$0xff] }
 0x198   :  { %730 = vmatpush3.bf16.msra.mxu1 %v729_v8  ;;  %v279_v11 = vadd.f32 %v274_v10, %v269_v9 }
 0x199   :  { %691 = vmatprep.subr.mxu1 %v796_v4 }
 0x19c   :  { %692 = vmatpush3.msra.mxu1 %v279_v11 }
 0x19d   :  { %694 = vmatmul.mubr.msk.f32.vlgmr.msra.gmra.mrb[0].mxu1 %vm315_vm11, %v280_v43 }
 0x19e   :  { %696 = vmatprep.mubr.msk.f32.mxu1 %vm795_vm3, %v796_v4 }
 0x1a1   :  { %697 = vmatmul.mubr.msk.f32.gmra.mrb[2].mxu1 %vm315_vm11, %v281_v50 }
 0x1a2   :  { %699 = vmatprep.mubr.msk.f32.mxu1 %vm795_vm3, %v796_v4 }
 0x1a5   :  { %700 = vmatmul.mubr.msk.f32.gmra.mrb[4].mxu1 %vm315_vm11, %v282_v56 }
 0x1a6   :  { %702 = vmatprep.mubr.msk.f32.mxu1 %vm795_vm3, %v796_v4 }
 0x1a9   :  { %703 = vmatmul.mubr.msk.f32.gmra.mrb[6].mxu1 %vm315_vm11, %v283_v12 }
 0x1aa   :  { %705 = vmatprep.mubr.msk.f32.mxu1 %vm795_vm3, %v796_v4 }
 0x1ad   :  { %706 = vmatmul.mubr.msk.f32.gmra.mrb[8].mxu1 %vm315_vm11, %v284_v13 }
 0x270   :  { %v397_v15 = vpop.f32.mrb[0].mxu1 }
 0x271   :  { %v398_v16 = vadd.f32 %v397_v15, %v293_v14  ;;  %v695_v17 = vpop.f32.mrb[1].mxu1 }
 0x273   :  { %v426_v19 = vmul.f32 0.01, %v398_v16  ;;  %vm421_vm12 = vcmp.gt.f32.partialorder %v398_v16, 0.0 }
 0x274   :  { %v402_v20 = vpop.f32.mrb[2].mxu1 }
 0x275   :  { %v403_v21 = vadd.f32 %v402_v20, %v298_v18  ;;  %v698_v22 = vpop.f32.mrb[3].mxu1  ;;  %v982_v23 = vsel %vm421_vm12, %v398_v16, %v426_v19 }
 0x276   :  { %v436_v24 = vsel %vm189_vm6, %v982_v23, 0.0  ;;  %v451_v26 = vmul.f32 %v982_v23, %v982_v23 }
 0x277   :  { %v427_v27 = vmul.f32 0.01, %v403_v21  ;;  %437 = vadd.xlane.f32.xlu0 %v436_v24  ;;  %vm422_vm13 = vcmp.gt.f32.partialorder %v403_v21, 0.0 }
 0x278   :  { %v407_v29 = vpop.f32.mrb[4].mxu1  ;;  %v456_v35 = vsel %vm189_vm6, %v451_v26, 0.0 }
 0x279   :  { %v408_v30 = vadd.f32 %v407_v29, %v303_v28  ;;  %v701_v31 = vpop.f32.mrb[5].mxu1  ;;  %v988_v32 = vsel %vm422_vm13, %v403_v21, %v427_v27 }
 0x27a   :  { %v439_v33 = vsel %vm189_vm6, %v988_v32, 0.0  ;;  %v452_v36 = vmul.f32 %v988_v32, %v988_v32 }
 0x27b   :  { %v428_v37 = vmul.f32 0.01, %v408_v30  ;;  %440 = vadd.xlane.f32.xlu1 %v439_v33  ;;  %457 = vadd.xlane.f32.xlu0 %v456_v35  ;;  %vm423_vm14 = vcmp.gt.f32.partialorder %v408_v30, 0.0 }
 0x27c   :  { %v412_v39 = vpop.f32.mrb[6].mxu1  ;;  %v459_v45 = vsel %vm189_vm6, %v452_v36, 0.0 }
 0x27d   :  { %v413_v40 = vadd.f32 %v412_v39, %v308_v38  ;;  %v704_v41 = vpop.f32.mrb[7].mxu1  ;;  %v995_v42 = vsel %vm423_vm14, %v408_v30, %v428_v37 }
 0x27e   :  { %v442_v44 = vsel %vm189_vm6, %v995_v42, 0.0  ;;  %v453_v46 = vmul.f32 %v995_v42, %v995_v42 }
 0x27f   :  { %v429_v47 = vmul.f32 0.01, %v413_v40  ;;  %443 = vadd.xlane.f32.xlu1 %v442_v44  ;;  %460 = vadd.xlane.f32.xlu0 %v459_v45  ;;  %vm424_vm15 = vcmp.gt.f32.partialorder %v413_v40, 0.0 }
 0x280   :  { %v417_v49 = vpop.f32.mrb[8].mxu1  ;;  %v462_v54 = vsel %vm189_vm6, %v453_v46, 0.0 }
 0x281   :  { %v418_v51 = vadd.f32 %v417_v49, %v313_v48  ;;  %v1002_v52 = vsel %vm424_vm15, %v413_v40, %v429_v47  ;;  %v707_v53 = vpop.f32.mrb[9].mxu1 }
 0x282   :  { %v445_v55 = vsel %vm189_vm6, %v1002_v52, 0.0  ;;  %v454_v57 = vmul.f32 %v1002_v52, %v1002_v52 }
 0x283   :  { %v430_v58 = vmul.f32 0.01, %v418_v51  ;;  %463 = vadd.xlane.f32.xlu1 %v462_v54  ;;  %446 = vadd.xlane.f32.xlu0 %v445_v55  ;;  %vm425_vm0 = vcmp.gt.f32.partialorder %v418_v51, 0.0 }
 0x284   :  { %v465_v61 = vsel %vm189_vm6, %v454_v57, 0.0 }
 0x285   :  { %v1009_v59 = vsel %vm425_vm0, %v418_v51, %v430_v58 }
 0x286   :  { %v448_v60 = vsel %vm189_vm6, %v1009_v59, 0.0  ;;  %v455_v62 = vmul.f32 %v1009_v59, %v1009_v59 }
 0x287   :  { %449 = vadd.xlane.f32.xlu1 %v448_v60  ;;  %466 = vadd.xlane.f32.xlu0 %v465_v61 }
 0x288   :  { %v468_v63 = vsel %vm189_vm6, %v455_v62, 0.0 }
 0x28b   :  { %469 = vadd.xlane.f32.xlu0 %v468_v63 }
 0x298   :  { %530 = vperm.xlu1 %744, %v527_v0  }
 0x304   :  { %v438_v1 = vpop.xlane.xlu0 %437 }
 0x305   :  { %v471_v25 = vmul.f32 0.0625, %v438_v1 }
 0x307   :  { %v481_v6 = vmul.f32 %v471_v25, %v471_v25  ;;  %v506_v41 = vsub.f32 0.0, %v471_v25 }
 0x308   :  { %v441_v3 = vpop.xlane.xlu1 %440  ;;  %v458_v5 = vpop.xlane.xlu0 %457 }
 0x309   :  { %v472_v34 = vmul.f32 0.0625, %v441_v3  ;;  %v476_v7 = vmul.f32 0.0625, %v458_v5 }
 0x30b   :  { %v486_v8 = vsub.f32 %v476_v7, %v481_v6  ;;  %v482_v11 = vmul.f32 %v472_v34, %v472_v34  ;;  %v507_v45 = vsub.f32 0.0, %v472_v34 }
 0x30c   :  { %v444_v9 = vpop.xlane.xlu1 %443  ;;  %v461_v10 = vpop.xlane.xlu0 %460 }
 0x30d   :  { %v491_v43 = vmax.f32 %v486_v8, 0.0  ;;  %v473_v50 = vmul.f32 0.0625, %v444_v9  ;;  %v477_v56 = vmul.f32 0.0625, %v461_v10 }
 0x30f   :  { %v496_v12 = vadd.f32 1e-05, %v491_v43  ;;  %v487_v13 = vsub.f32 %v477_v56, %v482_v11  ;;  %v483_v14 = vmul.f32 %v473_v50, %v473_v50  ;;  %v508_v58 = vsub.f32 0.0, %v473_v50 }
 0x310   :  { %v464_v15 = vpop.xlane.xlu1 %463  ;;  %v447_v16 = vpop.xlane.xlu0 %446 }
 0x311   :  { %755 = vrsqrt.f32 %v496_v12  ;;  %v492_v17 = vmax.f32 %v487_v13, 0.0  ;;  %v478_v18 = vmul.f32 0.0625, %v464_v15  ;;  %v474_v19 = vmul.f32 0.0625, %v447_v16 }
 0x313   :  { %v497_v20 = vadd.f32 1e-05, %v492_v17  ;;  %v488_v21 = vsub.f32 %v478_v18, %v483_v14  ;;  %v484_v22 = vmul.f32 %v474_v19, %v474_v19  ;;  %v509_v61 = vsub.f32 0.0, %v474_v19 }
 0x314   :  { %v450_v24 = vpop.xlane.xlu1 %449  ;;  %v467_v26 = vpop.xlane.xlu0 %466 }
 0x315   :  { %757 = vrsqrt.f32 %v497_v20  ;;  %v493_v27 = vmax.f32 %v488_v21, 0.0  ;;  %v475_v28 = vmul.f32 0.0625, %v450_v24  ;;  %v479_v29 = vmul.f32 0.0625, %v467_v26 }
 0x317   :  { %v498_v30 = vadd.f32 1e-05, %v493_v27  ;;  %v489_v31 = vsub.f32 %v479_v29, %v484_v22  ;;  %v485_v35 = vmul.f32 %v475_v28, %v475_v28  ;;  %v510_v25 = vsub.f32 0.0, %v475_v28 }
 0x318   :  { %v470_v33 = vpop.xlane.xlu0 %469 }
 0x319   :  { %759 = vrsqrt.f32 %v498_v30  ;;  %v494_v36 = vmax.f32 %v489_v31, 0.0  ;;  %v480_v37 = vmul.f32 0.0625, %v470_v33 }
 0x31b   :  { %v756_v38 = vpop.eup %755  ;;  %v499_v39 = vadd.f32 1e-05, %v494_v36  ;;  %v490_v40 = vsub.f32 %v480_v37, %v485_v35 }
 0x31c   :  { %v511_v46 = vmul.f32 %v756_v38, %v506_v41  ;;  %v516_v47 = vmul.f32 %v756_v38, %v982_v23 }
 0x31d   :  { %761 = vrsqrt.f32 %v499_v39  ;;  %v495_v44 = vmax.f32 %v490_v40, 0.0 }
 0x31e   :  { %v521_v54 = vadd.f32 %v516_v47, %v511_v46 }
 0x31f   :  { %v758_v48 = vpop.eup %757  ;;  %v500_v49 = vadd.f32 1e-05, %v495_v44 }
 0x320   :  { %v512_v51 = vmul.f32 %v758_v48, %v507_v45  ;;  %v517_v53 = vmul.f32 %v758_v48, %v988_v32 }
 0x321   :  { %763 = vrsqrt.f32 %v500_v49 }
 0x322   :  { %v522_v55 = vadd.f32 %v517_v53, %v512_v51 }
 0x323   :  { %v760_v57 = vpop.eup %759 }
 0x324   :  { %v732_v60 = vpack.c.bf16 %v522_v55, %v521_v54  ;;  %v513_v62 = vmul.f32 %v760_v57, %v508_v58  ;;  %v518_v63 = vmul.f32 %v760_v57, %v995_v42  ;;  %v526_v42 = vld [vmem:[%s1048_s5] sm:$0xf] }
 0x326   :  { %733 = vmatpush3.bf16.msra.mxu0 %v732_v60  ;;  %v523_v3 = vadd.f32 %v518_v63, %v513_v62 }
 0x327   :  { %v762_v0 = vpop.eup %761  ;;  %734 = vmatprep.subr.bf16.mxu0 %v793_v2  ;;  %v531_v2 = vpop.permute.xlu1 %530 }
 0x328   :  { %v514_v23 = vmul.f32 %v762_v0, %v509_v61  ;;  %v519_v1 = vmul.f32 %v762_v0, %v1002_v52 }
 0x32a   :  { %v524_v32 = vadd.f32 %v519_v1, %v514_v23 }
 0x32b   :  { %v764_v5 = vpop.eup %763 }
 0x32c   :  { %v735_v6 = vpack.c.bf16 %v524_v32, %v523_v3  ;;  %v515_v34 = vmul.f32 %v764_v5, %v510_v25  ;;  %v520_v7 = vmul.f32 %v764_v5, %v1009_v59 }
 0x32e   :  { %736 = vmatpush3.bf16.msra.mxu0 %v735_v6  ;;  %v525_v8 = vadd.f32 %v520_v7, %v515_v34 }
 0x32f   :  { %716 = vmatprep.subr.mxu0 %v796_v4 }
 0x332   :  { %717 = vmatpush3.msra.mxu0 %v525_v8 }
 0x333   :  { %719 = vmatmul.mubr.msk.f32.vlgmr.msra.gmra.mrb[10].mxu0 %vm315_vm11, %v526_v42 }
 0x406   :  { %v602_v52 = vpop.f32.mrb[10].mxu0 }
 0x407   :  { %v603_v9 = vadd.f32 %v602_v52, %v531_v2  ;;  %v720_v10 = vpop.f32.mrb[11].mxu0 }
 0x409   :  { %v640_v11 = vmul.f32 -1.442695, %v603_v9 }
 0x40b   :  { %765 = vpow2.f32 %v640_v11 }
 0x415   :  { %v766_v43 = vpop.eup %765 }
 0x416   :  { %v609_v50 = vadd.f32 1.0, %v766_v43 }
 0x418   :  { %767 = vrcp.f32 %v609_v50 }
 0x422   :  { %v768_v4 = vpop.eup %767 }
 0x423   :  { %613 = vst.msk [vmem:[#allocation2] sm:$0xf] %vm612_vm1, %v768_v4 }
 0x424   :  { %780 = shalt.err (!%p777_p4)
}
 0x425   :  { %s781_s22 = scalar_lea.hbm %s1050_s7, 64 }
 0x426   :  { %p782_p5 = scmp.ne.s32.totalorder %s1050_s7, %s781_s22  ;;  %p785_p6 = scmp.lt.u32.totalorder %s781_s22, %s1050_s7 }
 0x428   :  { %p787_p7 = pnand %p785_p6, %p782_p5 }
 0x42a   :  { %790 = shalt.err (!%p787_p7)
}
 0x42b   :  { %623 = dma.vmem_to_hbm [thread:$0]  %s621_s20, 64, %s1050_s7, [#allocation3]  }
 0x42c   :  { %791 = dma.done.wait [#allocation3], 64  }
 0x42d   :  { %792 = vsyncadd [#allocation3], 4294967232 }
 0x42e   :  { %627 = vsyncpa [#allocation3], 1 }

</bundles_post_ra>
